<compile_context>
chip_gen: v7x
topology: tpu7x:2x2x1
jax: 0.10.0
libtpu: 0.0.40
codegen_flags: <defaults>
</compile_context>

<pallas_src>
import functools

import jax
import jax.numpy as jnp
from jax.experimental import pallas as pl
from jax.experimental.pallas import tpu as pltpu

NUM_CLASSES = 64


def _round_up(n, m):
    return ((n + m - 1) // m) * m


def _label_smoothing_kernel(x_ref, t_ref, loss_ref, *, n_valid, block_rows,
                            confidence, smoothing):
    i = pl.program_id(0)

    x = x_ref[...].astype(jnp.float32)        # (bt, C) logits
    t = t_ref[...]                            # (bt, 1) int32 class index
    num_classes = x.shape[-1]

    # Row-wise, numerically stable log-softmax pieces (logprobs = s - lse,
    # never materialized; only its reductions are needed).
    m = jnp.max(x, axis=-1, keepdims=True)                      # (bt, 1)
    s = x - m                                                   # (bt, C)
    lse = jnp.log(jnp.sum(jnp.exp(s), axis=-1, keepdims=True))  # (bt, 1)

    # Target "gather" via lane-index compare + select (no one-hot multiply).
    col = jax.lax.broadcasted_iota(jnp.int32, s.shape, 1)       # (bt, C)
    s_t = jnp.sum(jnp.where(col == t, s, 0.0), axis=-1, keepdims=True)  # (bt, 1)
    sum_s = jnp.sum(s, axis=-1, keepdims=True)                  # (bt, 1)

    # confidence*(lse - s_t) + smoothing*(lse - sum_s/C)
    #   = lse - confidence*s_t - (smoothing/C)*sum_s   since confidence+smoothing == 1
    loss = lse - confidence * s_t - (smoothing / num_classes) * sum_s   # (bt, 1)

    # Mask rows added by batch padding so they contribute exactly 0.
    row = jax.lax.broadcasted_iota(jnp.int32, loss.shape, 0) + i * block_rows
    loss_ref[...] = jnp.where(row < n_valid, loss, 0.0)


def label_smoothing_loss(logits, target, *, smoothing=0.0, batch_tile=2048):
    """logits: (B, C) float, target: (B,) int class indices. Returns scalar loss."""
    B, C = logits.shape
    batch_tile = _round_up(max(batch_tile, 8), 8)
    bt = min(batch_tile, _round_up(B, 8))      # small batches -> small tile, no waste
    num_tiles = -(-B // bt)                    # cdiv
    B_pad = num_tiles * bt

    x = logits.astype(jnp.float32)
    t = target.astype(jnp.int32).reshape(B, 1)
    if B_pad != B:
        x = jnp.pad(x, ((0, B_pad - B), (0, 0)))
        t = jnp.pad(t, ((0, B_pad - B), (0, 0)))

    kernel = functools.partial(
        _label_smoothing_kernel,
        n_valid=B,
        block_rows=bt,
        confidence=1.0 - smoothing,
        smoothing=smoothing,
    )

    row_losses = pl.pallas_call(
        kernel,
        out_shape=jax.ShapeDtypeStruct((B_pad, 1), jnp.float32),
        grid_spec=pltpu.PrefetchScalarGridSpec(
            num_scalar_prefetch=0,
            grid=(num_tiles,),
            in_specs=[
                pl.BlockSpec((bt, C), lambda i: (i, 0)),
                pl.BlockSpec((bt, 1), lambda i: (i, 0)),
            ],
            out_specs=pl.BlockSpec((bt, 1), lambda i: (i, 0)),
        ),
        compiler_params=pltpu.CompilerParams(
            # No cross-iteration dependence -> fully parallel grid
            # (shards across both TensorCores on v7x / megacore).
            dimension_semantics=("parallel",),
        ),
    )(x, t)

    # Tiny final reduction (B floats) + mean scale done in plain JAX.
    return jnp.sum(row_losses) * (1.0 / B)


def _reference(logits, target, smoothing):
    logprobs = jax.nn.log_softmax(logits.astype(jnp.float32), axis=-1)
    nll = -jnp.take_along_axis(logprobs, target[:, None].astype(jnp.int32), axis=-1)[:, 0]
    smooth = -jnp.mean(logprobs, axis=-1)
    return jnp.mean((1.0 - smoothing) * nll + smoothing * smooth)


if __name__ == "__main__":
    key = jax.random.PRNGKey(0)
    k1, k2, k3, k4 = jax.random.split(key, 4)

    # Small shapes consistent with the module: x (B, num_classes), target (B,)
    B = 8
    logits = jax.random.normal(k1, (B, NUM_CLASSES), dtype=jnp.float32)
    target = jax.random.randint(k2, (B,), 0, NUM_CLASSES, dtype=jnp.int32)

    # Module default (smoothing=0.0) and a smoothed case.
    for sm in (0.0, 0.1):
        loss = jax.block_until_ready(label_smoothing_loss(logits, target, smoothing=sm))
        ref = _reference(logits, target, sm)
        assert jnp.allclose(loss, ref, rtol=1e-5, atol=1e-5), (sm, loss, ref)

    # Batch not a multiple of the tile/sublane width (exercises padding + mask).
    B2 = 13
    logits2 = jax.random.normal(k3, (B2, NUM_CLASSES), dtype=jnp.float32)
    target2 = jax.random.randint(k4, (B2,), 0, NUM_CLASSES, dtype=jnp.int32)
    loss2 = jax.block_until_ready(label_smoothing_loss(logits2, target2, smoothing=0.1))
    ref2 = _reference(logits2, target2, 0.1)
    assert jnp.allclose(loss2, ref2, rtol=1e-5, atol=1e-5), (loss2, ref2)

    print("KERNEL_OK")
</pallas_src>

<mosaic_0001>
module attributes {stable_mosaic.version = 11 : i64} {
  func.func @_label_smoothing_kernel(%arg0: i32, %arg1: memref<8x64xf32, #tpu.memory_space<vmem>>, %arg2: memref<8x1xi32, #tpu.memory_space<vmem>>, %arg3: memref<8x1xf32, #tpu.memory_space<vmem>>) attributes {dimension_semantics = [#tpu.dimension_semantics<parallel>], iteration_bounds = array<i64: 1>, scalar_prefetch = 0 : i64, scratch_operands = 0 : i64, tpu.core_type = #tpu.core_type<tc>, window_params = [{transform_indices = @transform_0, window_bounds = array<i64: 8, 64>}, {transform_indices = @transform_1, window_bounds = array<i64: 8, 1>}, {transform_indices = @transform_2, window_bounds = array<i64: 8, 1>}]} {
    %c0 = arith.constant 0 : index
    %c0_0 = arith.constant 0 : index
    %0 = vector.load %arg1[%c0, %c0_0] : memref<8x64xf32, #tpu.memory_space<vmem>>, vector<8x64xf32>
    %c0_1 = arith.constant 0 : index
    %c0_2 = arith.constant 0 : index
    %1 = vector.load %arg2[%c0_1, %c0_2] : memref<8x1xi32, #tpu.memory_space<vmem>>, vector<8x1xi32>
    %cst = arith.constant dense<0xFF800000> : vector<8xf32>
    %2 = vector.multi_reduction <maximumf>, %0, %cst [1] : vector<8x64xf32> to vector<8xf32>
    %3 = vector.shape_cast %2 : vector<8xf32> to vector<8x1xf32>
    %4 = vector.broadcast %3 : vector<8x1xf32> to vector<8x64xf32>
    %5 = arith.subf %0, %4 : vector<8x64xf32>
    %6 = math.exp %5 : vector<8x64xf32>
    %cst_3 = arith.constant dense<0.000000e+00> : vector<8xf32>
    %7 = vector.multi_reduction <add>, %6, %cst_3 [1] : vector<8x64xf32> to vector<8xf32>
    %8 = vector.shape_cast %7 : vector<8xf32> to vector<8x1xf32>
    %9 = math.log %8 : vector<8x1xf32>
    %10 = tpu.iota {dimensions = array<i32: 1>} : vector<8x64xi32>
    %11 = vector.broadcast %1 : vector<8x1xi32> to vector<8x64xi32>
    %12 = arith.cmpi eq, %10, %11 : vector<8x64xi32>
    %cst_4 = arith.constant 0.000000e+00 : f32
    %13 = vector.broadcast %cst_4 : f32 to vector<8x64xf32>
    %14 = arith.select %12, %5, %13 : vector<8x64xi1>, vector<8x64xf32>
    %cst_5 = arith.constant dense<0.000000e+00> : vector<8xf32>
    %15 = vector.multi_reduction <add>, %14, %cst_5 [1] : vector<8x64xf32> to vector<8xf32>
    %16 = vector.shape_cast %15 : vector<8xf32> to vector<8x1xf32>
    %cst_6 = arith.constant dense<0.000000e+00> : vector<8xf32>
    %17 = vector.multi_reduction <add>, %5, %cst_6 [1] : vector<8x64xf32> to vector<8xf32>
    %18 = vector.shape_cast %17 : vector<8xf32> to vector<8x1xf32>
    %cst_7 = arith.constant 1.000000e+00 : f32
    %19 = vector.broadcast %cst_7 : f32 to vector<8x1xf32>
    %20 = arith.mulf %19, %16 : vector<8x1xf32>
    %21 = arith.subf %9, %20 : vector<8x1xf32>
    %cst_8 = arith.constant 0.000000e+00 : f32
    %22 = vector.broadcast %cst_8 : f32 to vector<8x1xf32>
    %23 = arith.mulf %22, %18 : vector<8x1xf32>
    %24 = arith.subf %21, %23 : vector<8x1xf32>
    %25 = tpu.iota {dimensions = array<i32: 0>} : vector<8x1xi32>
    %c8_i32 = arith.constant 8 : i32
    %26 = arith.muli %arg0, %c8_i32 : i32
    %27 = vector.broadcast %26 : i32 to vector<8x1xi32>
    %28 = arith.addi %25, %27 : vector<8x1xi32>
    %c8_i32_9 = arith.constant 8 : i32
    %29 = vector.broadcast %c8_i32_9 : i32 to vector<8x1xi32>
    %30 = arith.cmpi slt, %28, %29 : vector<8x1xi32>
    %cst_10 = arith.constant 0.000000e+00 : f32
    %31 = vector.broadcast %cst_10 : f32 to vector<8x1xf32>
    %32 = arith.select %30, %24, %31 : vector<8x1xi1>, vector<8x1xf32>
    %c0_11 = arith.constant 0 : index
    %c0_12 = arith.constant 0 : index
    %33 = vector.load %arg3[%c0_11, %c0_12] : memref<8x1xf32, #tpu.memory_space<vmem>>, vector<8x1xf32>
    tpu.vector_store %arg3[%c0_11, %c0_12], %32 {strides = array<i32>} : memref<8x1xf32, #tpu.memory_space<vmem>>, vector<8x1xf32>,
    return
  }
  func.func @transform_0(%arg0: i32) -> (i32, i32) {
    %c0_i32 = arith.constant 0 : i32
    %c0_i32_0 = arith.constant 0 : i32
    return %arg0, %c0_i32 : i32, i32
  }
  func.func @transform_1(%arg0: i32) -> (i32, i32) {
    %c0_i32 = arith.constant 0 : i32
    %c0_i32_0 = arith.constant 0 : i32
    return %arg0, %c0_i32 : i32, i32
  }
  func.func @transform_2(%arg0: i32) -> (i32, i32) {
    %c0_i32 = arith.constant 0 : i32
    %c0_i32_0 = arith.constant 0 : i32
    return %arg0, %c0_i32 : i32, i32
  }
}

</mosaic_0001>

<bundles_post_ra>
// kernel: tpu_custom_call.1
= control target key start
LH: loop header
LB: loop body
LE: loop exit
PB: predicated region body
PF: predicated region fallthrough
CT: control target
= control target key end

     0   :  { %vm13_vm0 = vcmask 523264   ;;  %v60_v1 = vmov 0   ;;  %v25_v7 = vlaneseq  ;;  %vm48_vm2 = vcmask 7168   ;;  %s89_s0 = inlined_call_operand.vmem [shape: f32[8,64], index: 0, kind: input, shape index: {}]   ;;  %s90_s1 = inlined_call_operand.vmem [shape: s32[8,1], index: 1, kind: input, shape index: {}]   ;;  %s91_s2 = inlined_call_operand.vmem [shape: f32[8,1], index: 2, kind: output, shape index: {}]  }
   0x1   :  { %v11_v0 = vld [vmem:[%s89_s0] sm:$0xff]  ;;  %55 = vset.pattern.permute.xlu0 %v60_v1 }
   0x2   :  { %v14_v2 = vsel %vm13_vm0, %v11_v0, -inf  ;;  %v12_v3 = vld [vmem:[%s90_s1] sm:$0xff]  ;;  %v26_v8 = vand.u32 127, %v25_v7 }
   0x3   :  { %15 = vmax.xlane.f32.xlu0 %v14_v2 }
  0x19   :  { %28 = vperm.xlu0 %55, %v12_v3  }
  0x90   :  { %v16_v4 = vpop.xlane.xlu0 %15 }
  0x91   :  { %v17_v5 = vsub.f32 %v11_v0, %v16_v4 }
  0x93   :  { %v18_v6 = vmul.f32 1.442695, %v17_v5  ;;  %v35_v14 = vsel %vm13_vm0, %v17_v5, 0.0 }
  0x95   :  { %56 = vpow2.f32 %v18_v6 }
  0x98   :  { %v29_v9 = vpop.permute.xlu0 %28 }
  0x99   :  { %vm30_vm1 = vcmp.eq.s32.totalorder %v26_v8, %v29_v9 }
  0x9a   :  { %v31_v12 = vsel %vm30_vm1, %v17_v5, 0.0 }
  0x9b   :  { %v32_v13 = vsel %vm13_vm0, %v31_v12, 0.0 }
  0x9f   :  { %v57_v10 = vpop.eup %56 }
  0xa0   :  { %v20_v11 = vsel %vm13_vm0, %v57_v10, 0.0 }
  0xa1   :  { %21 = vadd.xlane.f32.xlu1 %v20_v11 }
  0xa5   :  { %33 = vadd.xlane.f32.xlu1 %v32_v13 }
  0xa9   :  { %36 = vadd.xlane.f32.xlu1 %v35_v14 }
 0x12e   :  { %v22_v15 = vpop.xlane.xlu1 %21 }
 0x12f   :  { %58 = vlog2.f32 %v22_v15 }
 0x132   :  { %v34_v16 = vpop.xlane.xlu1 %33 }
 0x136   :  { %v37_v18 = vpop.xlane.xlu1 %36 }
 0x137   :  { %v39_v21 = vmul.f32 0.0, %v37_v18 }
 0x139   :  { %v59_v17 = vpop.eup %58 }
 0x13a   :  { %v24_v19 = vmul.f32 0.6931472, %v59_v17 }
 0x13c   :  { %v38_v20 = vsub.f32 %v24_v19, %v34_v16 }
 0x13e   :  { %v40_v22 = vsub.f32 %v38_v20, %v39_v21 }
 0x140   :  { %49 = vst.msk [vmem:[%s91_s2] sm:$0xff] %vm48_vm2, %v40_v22 }

</bundles_post_ra>
